<compile_context>
chip_gen: v5e
topology: v5e:2x2
jax: 0.10.0
libtpu: 0.0.40
codegen_flags: <defaults>
</compile_context>

<pallas_src>
import jax
import jax.numpy as jnp
from jax.experimental import pallas as pl
from jax.experimental.pallas import tpu as pltpu


# ----------------------------- Pallas kernel -----------------------------

def _moe_ffn_kernel(x_ref, g_ref, b_ref, w1_ref, b1_ref, w2_ref, b2_ref, cw_ref,
                    o_ref, xn_ref, acc_ref):
    # grid: (token tile i, expert e, F-contraction tile f); e/f are reduction axes.
    e = pl.program_id(1)
    f = pl.program_id(2)
    last_e = pl.num_programs(1) - 1
    last_f = pl.num_programs(2) - 1

    @pl.when((e == 0) & (f == 0))
    def _():
        # Fused pre-LayerNorm: computed once per token tile, cached in VMEM as bf16.
        x = x_ref[...].astype(jnp.float32)
        mu = jnp.mean(x, axis=-1, keepdims=True)
        var = jnp.mean(jnp.square(x - mu), axis=-1, keepdims=True)
        xn = (x - mu) * jax.lax.rsqrt(var + 1e-5) * g_ref[...] + b_ref[...]
        xn_ref[...] = xn.astype(xn_ref.dtype)
        acc_ref[...] = jnp.zeros_like(acc_ref)

    xn = xn_ref[...]                                                     # (TN, D) bf16
    h = jnp.dot(xn, w1_ref[0], preferred_element_type=jnp.float32)       # (TN, TF) f32 (MXU)
    h = jnp.maximum(h + b1_ref[0], 0.0).astype(xn.dtype)                 # relu -> bf16
    y = jnp.dot(h, w2_ref[0], preferred_element_type=jnp.float32)        # (TN, D) f32 (MXU)
    y = y + (f == 0).astype(jnp.float32) * b2_ref[0]                     # expert out-bias once

    # Top-1 combine weight for expert e: one-hot lane select from the resident (TN, E) tile.
    cw = cw_ref[...]
    lane = jax.lax.broadcasted_iota(jnp.int32, cw.shape, 1)
    scale = jnp.sum(jnp.where(lane == e, cw, 0.0), axis=-1, keepdims=True)   # (TN, 1)

    acc_ref[...] += scale * y

    @pl.when((e == last_e) & (f == last_f))
    def _():
        # Residual add + cast inside the kernel: single HBM writeback in the final dtype.
        o_ref[...] = (acc_ref[...] + x_ref[...].astype(jnp.float32)).astype(o_ref.dtype)


# ----------------------------- wrappers -----------------------------

def _round_up(n, m):
    return (n + m - 1) // m * m


def _pick_f_tile(F, max_tf):
    """Largest multiple of 128 that divides F and is <= max_tf; full F if it is small enough."""
    if F <= max_tf:
        return F
    t = (max_tf // 128) * 128
    while t >= 128:
        if F % t == 0:
            return t
        t -= 128
    return F


def moe_ffn(x2d, cw, params, *, max_tn=512, max_tf=512,
            vmem_limit_bytes=48 * 1024 * 1024):
    """Fused LayerNorm + top-1 MoE FFN + residual.  x2d: (N, D); cw: (N, E) combine weights."""
    N, D = x2d.shape
    E, _, F = params["w1"].shape

    TN = min(max_tn, _round_up(N, 8))          # token tile (second-minor dim -> multiple of 8)
    N_pad = _round_up(N, TN)
    TF = _pick_f_tile(F, max_tf)               # F-contraction tile (lane dim -> multiple of 128)

    pad = N_pad - N
    x_p = jnp.pad(x2d, ((0, pad), (0, 0))) if pad else x2d
    cw_p = jnp.pad(cw, ((0, pad), (0, 0))) if pad else cw      # pad tokens get zero combine weight

    grid = (N_pad // TN, E, F // TF)

    out = pl.pallas_call(
        _moe_ffn_kernel,
        out_shape=jax.ShapeDtypeStruct((N_pad, D), x2d.dtype),
        grid=grid,
        in_specs=[
            pl.BlockSpec((TN, D), lambda i, e, f: (i, 0)),         # x / residual (token-tile resident)
            pl.BlockSpec((1, D), lambda i, e, f: (0, 0)),          # LN gamma
            pl.BlockSpec((1, D), lambda i, e, f: (0, 0)),          # LN beta
            pl.BlockSpec((1, D, TF), lambda i, e, f: (e, 0, f)),   # W1 slice (bf16)
            pl.BlockSpec((1, 1, TF), lambda i, e, f: (e, 0, f)),   # b1 slice
            pl.BlockSpec((1, TF, D), lambda i, e, f: (e, f, 0)),   # W2 slice (bf16)
            pl.BlockSpec((1, 1, D), lambda i, e, f: (e, 0, 0)),    # b2
            pl.BlockSpec((TN, E), lambda i, e, f: (i, 0)),         # combine weights (lane-dense)
        ],
        out_specs=pl.BlockSpec((TN, D), lambda i, e, f: (i, 0)),
        scratch_shapes=[
            pltpu.VMEM((TN, D), jnp.bfloat16),    # cached LayerNorm(x) for the current token tile
            pltpu.VMEM((TN, D), jnp.float32),     # f32 output accumulator
        ],
        compiler_params=pltpu.CompilerParams(
            dimension_semantics=("parallel", "arbitrary", "arbitrary"),
            vmem_limit_bytes=vmem_limit_bytes,
        ),
    )(x_p, params["ln_g"].reshape(1, D), params["ln_b"].reshape(1, D),
      params["w1"], params["b1"], params["w2"], params["b2"], cw_p)
    return out[:N]


def unilm_base_moe_layer(x, params, *, max_tn=512, max_tf=512):
    """x: (T, B, D) seq-first (fairseq). Returns (out (T, B, D), l_aux)."""
    T, B, D = x.shape
    E = params["wg"].shape[1]
    N = T * B
    x2d = x.reshape(N, D)

    # ---- Top-1 gate path (fp32 gating; tiny D x E matmul kept in plain XLA) ----
    xf = x2d.astype(jnp.float32)
    mu = jnp.mean(xf, axis=-1, keepdims=True)
    var = jnp.mean(jnp.square(xf - mu), axis=-1, keepdims=True)
    xn = (xf - mu) * jax.lax.rsqrt(var + 1e-5) * params["ln_g"] + params["ln_b"]
    logits = xn @ params["wg"]
    probs = jax.nn.softmax(logits, axis=-1)
    idx = jnp.argmax(probs, axis=-1)
    mask1 = jax.nn.one_hot(idx, E, dtype=jnp.float32)
    gate = jnp.sum(probs * mask1, axis=-1)
    l_aux = jnp.sum(jnp.mean(probs, axis=0) * jnp.mean(mask1, axis=0)) * E
    cw = mask1 * gate[:, None]                                        # (N, E), lane-dense

    out = moe_ffn(x2d, cw, params, max_tn=max_tn, max_tf=max_tf)
    return out.reshape(T, B, D), l_aux


# ----------------------------- params + reference -----------------------------

def init_params(key, D, F, E):
    ks = jax.random.split(key, 7)
    s1 = 1.0 / jnp.sqrt(D)
    s2 = 1.0 / jnp.sqrt(F)
    return dict(
        ln_g=1.0 + 0.1 * jax.random.normal(ks[0], (D,), jnp.float32),
        ln_b=0.1 * jax.random.normal(ks[1], (D,), jnp.float32),
        wg=jax.random.uniform(ks[2], (D, E), jnp.float32, -s1, s1),
        # Expert FFN weights stored in bf16 (MXU fast path); biases / LN / gate stay f32.
        w1=jax.random.uniform(ks[3], (E, D, F), jnp.float32, -s1, s1).astype(jnp.bfloat16),
        b1=jax.random.uniform(ks[4], (E, 1, F), jnp.float32, -s1, s1),
        w2=jax.random.uniform(ks[5], (E, F, D), jnp.float32, -s2, s2).astype(jnp.bfloat16),
        b2=jax.random.uniform(ks[6], (E, 1, D), jnp.float32, -s2, s2),
    )


def reference(x, params):
    """Pure-JAX reference of the same forward (bf16 FFN matmuls, f32 accumulation)."""
    T, B, D = x.shape
    E = params["wg"].shape[1]
    res = x.reshape(-1, D).astype(jnp.float32)
    mu = jnp.mean(res, -1, keepdims=True)
    var = jnp.mean(jnp.square(res - mu), -1, keepdims=True)
    xn = (res - mu) * jax.lax.rsqrt(var + 1e-5) * params["ln_g"] + params["ln_b"]
    logits = xn @ params["wg"]
    probs = jax.nn.softmax(logits, -1)
    idx = jnp.argmax(probs, -1)
    mask1 = jax.nn.one_hot(idx, E, dtype=jnp.float32)
    gate = jnp.sum(probs * mask1, -1)
    xb = xn.astype(jnp.bfloat16)
    out = jnp.zeros_like(res)
    for e in range(E):
        h = jnp.maximum(jnp.dot(xb, params["w1"][e], preferred_element_type=jnp.float32)
                        + params["b1"][e][0], 0.0)
        y = jnp.dot(h.astype(jnp.bfloat16), params["w2"][e],
                    preferred_element_type=jnp.float32) + params["b2"][e][0]
        out = out + (mask1[:, e] * gate)[:, None] * y
    out = out + res
    l_aux = jnp.sum(jnp.mean(probs, 0) * jnp.mean(mask1, 0)) * E
    return out.reshape(T, B, D).astype(x.dtype), l_aux


if __name__ == "__main__":
    key = jax.random.PRNGKey(0)
    # seq=10, batch=3, embed_dim=32, ffn_dim=256, moe_expert_count=4
    T, B, D, F, E = 10, 3, 32, 256, 4
    kx, kp = jax.random.split(key)
    x = jax.random.normal(kx, (T, B, D), jnp.float32)
    params = init_params(kp, D, F, E)

    # Small tile caps so the toy shapes exercise token tiling, N-padding and F-contraction tiling.
    out, l_aux = unilm_base_moe_layer(x, params, max_tn=16, max_tf=128)
    jax.block_until_ready((out, l_aux))

    ref_out, ref_laux = reference(x, params)
    assert out.shape == (T, B, D)
    assert out.dtype == x.dtype
    assert jnp.allclose(out, ref_out, atol=5e-3, rtol=5e-3), "output mismatch vs reference"
    assert jnp.allclose(l_aux, ref_laux, atol=1e-5), "l_aux mismatch vs reference"
    print("KERNEL_OK")
</pallas_src>

<mosaic_0001>
module attributes {stable_mosaic.version = 11 : i64} {
  func.func @_moe_ffn_kernel(%arg0: i32, %arg1: i32, %arg2: i32, %arg3: memref<16x32xf32, #tpu.memory_space<vmem>>, %arg4: memref<1x32xf32, #tpu.memory_space<vmem>>, %arg5: memref<1x32xf32, #tpu.memory_space<vmem>>, %arg6: memref<1x32x128xbf16, #tpu.memory_space<vmem>>, %arg7: memref<1x1x128xf32, #tpu.memory_space<vmem>>, %arg8: memref<1x128x32xbf16, #tpu.memory_space<vmem>>, %arg9: memref<1x1x32xf32, #tpu.memory_space<vmem>>, %arg10: memref<16x4xf32, #tpu.memory_space<vmem>>, %arg11: memref<16x32xf32, #tpu.memory_space<vmem>>, %arg12: memref<16x32xbf16, #tpu.memory_space<vmem>>, %arg13: memref<16x32xf32, #tpu.memory_space<vmem>>) attributes {dimension_semantics = [#tpu.dimension_semantics<parallel>, #tpu.dimension_semantics<arbitrary>, #tpu.dimension_semantics<arbitrary>], iteration_bounds = array<i64: 2, 4, 2>, scalar_prefetch = 0 : i64, scratch_operands = 2 : i64, tpu.core_type = #tpu.core_type<tc>, window_params = [{transform_indices = @transform_0, window_bounds = array<i64: 16, 32>}, {pipeline_mode = #tpu.pipeline_mode<synchronous>, transform_indices = @transform_1, window_bounds = array<i64: 1, 32>}, {pipeline_mode = #tpu.pipeline_mode<synchronous>, transform_indices = @transform_2, window_bounds = array<i64: 1, 32>}, {transform_indices = @transform_3, window_bounds = array<i64: 1, 32, 128>}, {transform_indices = @transform_4, window_bounds = array<i64: 1, 1, 128>}, {transform_indices = @transform_5, window_bounds = array<i64: 1, 128, 32>}, {transform_indices = @transform_6, window_bounds = array<i64: 1, 1, 32>}, {transform_indices = @transform_7, window_bounds = array<i64: 16, 4>}, {transform_indices = @transform_8, window_bounds = array<i64: 16, 32>}]} {
    %c0_i32 = arith.constant 0 : i32
    %0 = arith.cmpi eq, %arg1, %c0_i32 : i32
    %c0_i32_0 = arith.constant 0 : i32
    %1 = arith.cmpi eq, %arg2, %c0_i32_0 : i32
    %2 = arith.andi %0, %1 : i1
    %3 = arith.extui %2 : i1 to i32
    %c0_i32_1 = arith.constant 0 : i32
    %4 = arith.cmpi ne, %3, %c0_i32_1 : i32
    scf.if %4 {
      %c0_27 = arith.constant 0 : index
      %c0_28 = arith.constant 0 : index
      %46 = vector.load %arg3[%c0_27, %c0_28] : memref<16x32xf32, #tpu.memory_space<vmem>>, vector<16x32xf32>
      %cst_29 = arith.constant dense<0.000000e+00> : vector<16xf32>
      %47 = vector.multi_reduction <add>, %46, %cst_29 [1] : vector<16x32xf32> to vector<16xf32>
      %48 = vector.shape_cast %47 : vector<16xf32> to vector<16x1xf32>
      %cst_30 = arith.constant 3.200000e+01 : f32
      %49 = vector.broadcast %cst_30 : f32 to vector<16x1xf32>
      %50 = arith.divf %48, %49 : vector<16x1xf32>
      %51 = vector.broadcast %50 : vector<16x1xf32> to vector<16x32xf32>
      %52 = arith.subf %46, %51 : vector<16x32xf32>
      %53 = arith.mulf %52, %52 : vector<16x32xf32>
      %cst_31 = arith.constant dense<0.000000e+00> : vector<16xf32>
      %54 = vector.multi_reduction <add>, %53, %cst_31 [1] : vector<16x32xf32> to vector<16xf32>
      %55 = vector.shape_cast %54 : vector<16xf32> to vector<16x1xf32>
      %cst_32 = arith.constant 3.200000e+01 : f32
      %56 = vector.broadcast %cst_32 : f32 to vector<16x1xf32>
      %57 = arith.divf %55, %56 : vector<16x1xf32>
      %58 = vector.broadcast %50 : vector<16x1xf32> to vector<16x32xf32>
      %59 = arith.subf %46, %58 : vector<16x32xf32>
      %cst_33 = arith.constant 9.99999974E-6 : f32
      %60 = vector.broadcast %cst_33 : f32 to vector<16x1xf32>
      %61 = arith.addf %57, %60 : vector<16x1xf32>
      %62 = math.rsqrt %61 : vector<16x1xf32>
      %63 = vector.broadcast %62 : vector<16x1xf32> to vector<16x32xf32>
      %64 = arith.mulf %59, %63 : vector<16x32xf32>
      %c0_34 = arith.constant 0 : index
      %c0_35 = arith.constant 0 : index
      %65 = vector.load %arg4[%c0_34, %c0_35] : memref<1x32xf32, #tpu.memory_space<vmem>>, vector<1x32xf32>
      %66 = vector.broadcast %65 : vector<1x32xf32> to vector<16x32xf32>
      %67 = arith.mulf %64, %66 : vector<16x32xf32>
      %c0_36 = arith.constant 0 : index
      %c0_37 = arith.constant 0 : index
      %68 = vector.load %arg5[%c0_36, %c0_37] : memref<1x32xf32, #tpu.memory_space<vmem>>, vector<1x32xf32>
      %69 = vector.broadcast %68 : vector<1x32xf32> to vector<16x32xf32>
      %70 = arith.addf %67, %69 : vector<16x32xf32>
      %71 = arith.truncf %70 : vector<16x32xf32> to vector<16x32xbf16>
      %c0_38 = arith.constant 0 : index
      %c0_39 = arith.constant 0 : index
      %72 = vector.load %arg12[%c0_38, %c0_39] : memref<16x32xbf16, #tpu.memory_space<vmem>>, vector<16x32xbf16>
      tpu.vector_store %arg12[%c0_38, %c0_39], %71 {strides = array<i32>} : memref<16x32xbf16, #tpu.memory_space<vmem>>, vector<16x32xbf16>,
      %cst_40 = arith.constant 0.000000e+00 : f32
      %73 = vector.broadcast %cst_40 : f32 to vector<16x32xf32>
      %c0_41 = arith.constant 0 : index
      %c0_42 = arith.constant 0 : index
      %74 = vector.load %arg13[%c0_41, %c0_42] : memref<16x32xf32, #tpu.memory_space<vmem>>, vector<16x32xf32>
      tpu.vector_store %arg13[%c0_41, %c0_42], %73 {strides = array<i32>} : memref<16x32xf32, #tpu.memory_space<vmem>>, vector<16x32xf32>,
    } else {
    }
    %c0 = arith.constant 0 : index
    %c0_2 = arith.constant 0 : index
    %5 = vector.load %arg12[%c0, %c0_2] : memref<16x32xbf16, #tpu.memory_space<vmem>>, vector<16x32xbf16>
    %c0_3 = arith.constant 0 : index
    %c0_4 = arith.constant 0 : index
    %c0_5 = arith.constant 0 : index
    %6 = vector.load %arg6[%c0_3, %c0_4, %c0_5] : memref<1x32x128xbf16, #tpu.memory_space<vmem>>, vector<1x32x128xbf16>
    %7 = vector.shape_cast %6 : vector<1x32x128xbf16> to vector<32x128xbf16>
    %cst = arith.constant dense<0.000000e+00> : vector<16x128xf32>
    %8 = tpu.matmul %5, %7, %cst {dimension_numbers = #tpu.dot_dimension_numbers<[1], [0], [0], [1], [0, 0, 1, 1], [], []>} : vector<16x32xbf16>, vector<32x128xbf16>, vector<16x128xf32> -> vector<16x128xf32>
    %c0_6 = arith.constant 0 : index
    %c0_7 = arith.constant 0 : index
    %c0_8 = arith.constant 0 : index
    %9 = vector.load %arg7[%c0_6, %c0_7, %c0_8] : memref<1x1x128xf32, #tpu.memory_space<vmem>>, vector<1x1x128xf32>
    %10 = vector.shape_cast %9 : vector<1x1x128xf32> to vector<1x128xf32>
    %11 = vector.broadcast %10 : vector<1x128xf32> to vector<16x128xf32>
    %12 = arith.addf %8, %11 : vector<16x128xf32>
    %cst_9 = arith.constant 0.000000e+00 : f32
    %13 = vector.broadcast %cst_9 : f32 to vector<16x128xf32>
    %14 = arith.maximumf %12, %13 : vector<16x128xf32>
    %15 = arith.truncf %14 : vector<16x128xf32> to vector<16x128xbf16>
    %c0_10 = arith.constant 0 : index
    %c0_11 = arith.constant 0 : index
    %c0_12 = arith.constant 0 : index
    %16 = vector.load %arg8[%c0_10, %c0_11, %c0_12] : memref<1x128x32xbf16, #tpu.memory_space<vmem>>, vector<1x128x32xbf16>
    %17 = vector.shape_cast %16 : vector<1x128x32xbf16> to vector<128x32xbf16>
    %cst_13 = arith.constant dense<0.000000e+00> : vector<16x32xf32>
    %18 = tpu.matmul %15, %17, %cst_13 {dimension_numbers = #tpu.dot_dimension_numbers<[1], [0], [0], [1], [0, 0, 1, 1], [], []>} : vector<16x128xbf16>, vector<128x32xbf16>, vector<16x32xf32> -> vector<16x32xf32>
    %c0_i32_14 = arith.constant 0 : i32
    %19 = arith.cmpi eq, %arg2, %c0_i32_14 : i32
    %20 = arith.extui %19 : i1 to i32
    %21 = arith.sitofp %20 : i32 to f32
    %c0_15 = arith.constant 0 : index
    %c0_16 = arith.constant 0 : index
    %c0_17 = arith.constant 0 : index
    %22 = vector.load %arg9[%c0_15, %c0_16, %c0_17] : memref<1x1x32xf32, #tpu.memory_space<vmem>>, vector<1x1x32xf32>
    %23 = vector.shape_cast %22 : vector<1x1x32xf32> to vector<1x32xf32>
    %24 = vector.broadcast %21 : f32 to vector<1x32xf32>
    %25 = arith.mulf %24, %23 : vector<1x32xf32>
    %26 = vector.broadcast %25 : vector<1x32xf32> to vector<16x32xf32>
    %27 = arith.addf %18, %26 : vector<16x32xf32>
    %c0_18 = arith.constant 0 : index
    %c0_19 = arith.constant 0 : index
    %28 = vector.load %arg10[%c0_18, %c0_19] : memref<16x4xf32, #tpu.memory_space<vmem>>, vector<16x4xf32>
    %29 = tpu.iota {dimensions = array<i32: 1>} : vector<16x4xi32>
    %30 = vector.broadcast %arg1 : i32 to vector<16x4xi32>
    %31 = arith.cmpi eq, %29, %30 : vector<16x4xi32>
    %cst_20 = arith.constant 0.000000e+00 : f32
    %32 = vector.broadcast %cst_20 : f32 to vector<16x4xf32>
    %33 = arith.select %31, %28, %32 : vector<16x4xi1>, vector<16x4xf32>
    %cst_21 = arith.constant dense<0.000000e+00> : vector<16xf32>
    %34 = vector.multi_reduction <add>, %33, %cst_21 [1] : vector<16x4xf32> to vector<16xf32>
    %35 = vector.shape_cast %34 : vector<16xf32> to vector<16x1xf32>
    %c0_22 = arith.constant 0 : index
    %c0_23 = arith.constant 0 : index
    %36 = vector.load %arg13[%c0_22, %c0_23] : memref<16x32xf32, #tpu.memory_space<vmem>>, vector<16x32xf32>
    %37 = vector.broadcast %35 : vector<16x1xf32> to vector<16x32xf32>
    %38 = arith.mulf %37, %27 : vector<16x32xf32>
    %39 = arith.addf %36, %38 : vector<16x32xf32>
    %c0_24 = arith.constant 0 : index
    %c0_25 = arith.constant 0 : index
    %40 = vector.load %arg13[%c0_24, %c0_25] : memref<16x32xf32, #tpu.memory_space<vmem>>, vector<16x32xf32>
    tpu.vector_store %arg13[%c0_24, %c0_25], %39 {strides = array<i32>} : memref<16x32xf32, #tpu.memory_space<vmem>>, vector<16x32xf32>,
    %c3_i32 = arith.constant 3 : i32
    %41 = arith.cmpi eq, %arg1, %c3_i32 : i32
    %c1_i32 = arith.constant 1 : i32
    %42 = arith.cmpi eq, %arg2, %c1_i32 : i32
    %43 = arith.andi %41, %42 : i1
    %44 = arith.extui %43 : i1 to i32
    %c0_i32_26 = arith.constant 0 : i32
    %45 = arith.cmpi ne, %44, %c0_i32_26 : i32
    scf.if %45 {
      %c0_27 = arith.constant 0 : index
      %c0_28 = arith.constant 0 : index
      %46 = vector.load %arg13[%c0_27, %c0_28] : memref<16x32xf32, #tpu.memory_space<vmem>>, vector<16x32xf32>
      %c0_29 = arith.constant 0 : index
      %c0_30 = arith.constant 0 : index
      %47 = vector.load %arg3[%c0_29, %c0_30] : memref<16x32xf32, #tpu.memory_space<vmem>>, vector<16x32xf32>
      %48 = arith.addf %46, %47 : vector<16x32xf32>
      %c0_31 = arith.constant 0 : index
      %c0_32 = arith.constant 0 : index
      %49 = vector.load %arg11[%c0_31, %c0_32] : memref<16x32xf32, #tpu.memory_space<vmem>>, vector<16x32xf32>
      tpu.vector_store %arg11[%c0_31, %c0_32], %48 {strides = array<i32>} : memref<16x32xf32, #tpu.memory_space<vmem>>, vector<16x32xf32>,
    } else {
    }
    return
  }
  func.func @transform_0(%arg0: i32, %arg1: i32, %arg2: i32) -> (i32, i32) {
    %c0_i32 = arith.constant 0 : i32
    %c0_i32_0 = arith.constant 0 : i32
    return %arg0, %c0_i32 : i32, i32
  }
  func.func @transform_1(%arg0: i32, %arg1: i32, %arg2: i32) -> (i32, i32) {
    %c0_i32 = arith.constant 0 : i32
    %c0_i32_0 = arith.constant 0 : i32
    %c0_i32_1 = arith.constant 0 : i32
    return %c0_i32, %c0_i32_0 : i32, i32
  }
  func.func @transform_2(%arg0: i32, %arg1: i32, %arg2: i32) -> (i32, i32) {
    %c0_i32 = arith.constant 0 : i32
    %c0_i32_0 = arith.constant 0 : i32
    %c0_i32_1 = arith.constant 0 : i32
    return %c0_i32, %c0_i32_0 : i32, i32
  }
  func.func @transform_3(%arg0: i32, %arg1: i32, %arg2: i32) -> (i32, i32, i32) {
    %c0_i32 = arith.constant 0 : i32
    %c0_i32_0 = arith.constant 0 : i32
    return %arg1, %c0_i32, %arg2 : i32, i32, i32
  }
  func.func @transform_4(%arg0: i32, %arg1: i32, %arg2: i32) -> (i32, i32, i32) {
    %c0_i32 = arith.constant 0 : i32
    %c0_i32_0 = arith.constant 0 : i32
    return %arg1, %c0_i32, %arg2 : i32, i32, i32
  }
  func.func @transform_5(%arg0: i32, %arg1: i32, %arg2: i32) -> (i32, i32, i32) {
    %c0_i32 = arith.constant 0 : i32
    %c0_i32_0 = arith.constant 0 : i32
    return %arg1, %arg2, %c0_i32 : i32, i32, i32
  }
  func.func @transform_6(%arg0: i32, %arg1: i32, %arg2: i32) -> (i32, i32, i32) {
    %c0_i32 = arith.constant 0 : i32
    %c0_i32_0 = arith.constant 0 : i32
    %c0_i32_1 = arith.constant 0 : i32
    return %arg1, %c0_i32, %c0_i32_0 : i32, i32, i32
  }
  func.func @transform_7(%arg0: i32, %arg1: i32, %arg2: i32) -> (i32, i32) {
    %c0_i32 = arith.constant 0 : i32
    %c0_i32_0 = arith.constant 0 : i32
    return %arg0, %c0_i32 : i32, i32
  }
  func.func @transform_8(%arg0: i32, %arg1: i32, %arg2: i32) -> (i32, i32) {
    %c0_i32 = arith.constant 0 : i32
    %c0_i32_0 = arith.constant 0 : i32
    return %arg0, %c0_i32 : i32, i32
  }
}

</mosaic_0001>

<bundles_post_ra>
// kernel: tpu_custom_call.1
= control target key start
LH: loop header
LB: loop body
LE: loop exit
PB: predicated region body
PF: predicated region fallthrough
CT: control target
= control target key end

     0   :  { %s1578_s0 = inlined_call_operand.vmem [shape: f32[32,32], index: 0, kind: input, shape index: {}]   ;;  %s1579_s1 = inlined_call_operand.vmem [shape: f32[1,32], index: 1, kind: input, shape index: {}]   ;;  %s1580_s2 = inlined_call_operand.vmem [shape: f32[1,32], index: 2, kind: input, shape index: {}]   ;;  %s1581_s3 = inlined_call_operand.vmem [shape: bf16[4,32,256], index: 3, kind: input, shape index: {}]   ;;  %s1582_s4 = inlined_call_operand.vmem [shape: f32[4,1,256], index: 4, kind: input, shape index: {}]   ;;  %s1583_s5 = inlined_call_operand.vmem [shape: bf16[4,256,32], index: 5, kind: input, shape index: {}]   ;;  %s1584_s6 = inlined_call_operand.vmem [shape: f32[4,1,32], index: 6, kind: input, shape index: {}]   ;;  %s1585_s7 = inlined_call_operand.vmem [shape: f32[32,4], index: 7, kind: input, shape index: {}]   ;;  %s1586_s8 = inlined_call_operand.hbm [shape: f32[32,32], index: 8, kind: output, shape index: {}]  }
   0x1   :  { %1598 = sst [smem:[#allocation19_spill]] %s1578_s0 }
   0x2   :  { %1599 = sst [smem:[#allocation20_spill]] %s1579_s1 }
   0x3   :  { %1600 = sst [smem:[#allocation21_spill]] %s1580_s2 }
   0x4   :  { %1601 = sst [smem:[#allocation22_spill]] %s1581_s3 }
   0x5   :  { %1602 = sst [smem:[#allocation23_spill]] %s1583_s5 }
   0x6   :  { %1603 = sst [smem:[#allocation24_spill]] %s1586_s8 }
   0x7   :  { %13 = vsyncpa [#allocation6], 0 }
   0x8   :  { %15 = vsyncpa [#allocation6 + $0x1], 0  ;;  %s1298_s27 = smov 0   ;;  %s1300_s28 = smov 0  }
   0x9   :  { %s1302_s29 = smov 0   ;;  %s1304_s30 = smov 0  }
   0xa   :  { %s1306_s9 = smov 0   ;;  %s1308_s10 = smov 0  }
   0xb   :  { %s1310_s11 = smov 0   ;;  %s1312_s12 = smov 0  }
   0xc   :  { %s1314_s13 = smov 0   ;;  %s1316_s14 = smov 0  }
   0xd   :  { %s1318_s15 = smov 0   ;;  %s1320_s16 = smov 0  }
   0xe LB: > { %1604 = sst [smem:[#allocation8_spill]] %s1211_s29  ;;  %s925_s17 = sadd.s32 4294967295, %s1247_s16   ;;  %s1247_s16 = sphi %s1320_s16, %s21_s16   ;;  %s1243_s15 = sphi %s1318_s15, %s1637_s15   ;;  %s1239_s14 = sphi %s1316_s14, %s1636_s14   ;;  %s1235_s13 = sphi %s1314_s13, %s1635_s13   ;;  %s1231_s12 = sphi %s1312_s12, %s1634_s12   ;;  %s1227_s11 = sphi %s1310_s11, %s1633_s11   ;;  %s1223_s10 = sphi %s1308_s10, %s1632_s10   ;;  %s1219_s9 = sphi %s1306_s9, %s1631_s9   ;;  %s1215_s30 = sphi %s1304_s30, %s1630_s30   ;;  %s1211_s29 = sphi %s1302_s29, %s1629_s29   ;;  %s1207_s28 = sphi %s1300_s28, %s1639_s28   ;;  %s1203_s27 = sphi %s1298_s27, %s1638_s27  }
   0xf   : > { %1605 = sst [smem:[#allocation9_spill]] %s1219_s9  ;;  %s926_s18 = sadd.s32 4294967294, %s1247_s16  }
  0x10   : > { %1606 = sst [smem:[#allocation10_spill]] %s1235_s13  ;;  %s33_s19 = sadd.s32 1, %s1235_s13 }
  0x11   : > { %1607 = sst [smem:[#allocation11_spill]] %s1239_s14  ;;  %s36_s20 = sadd.s32 1, %s1239_s14 }
  0x12   : > { %1608 = sst [smem:[#allocation12_spill]] %s1243_s15  ;;  %p34_p0 = scmp.ge.s32.totalorder %s33_s19, 2 }
  0x13   : > { %s40_s21 = sadd.s32 1, %s1243_s15  ;;  %s117_s22 = sadd.s32 1, %s1219_s9 }
  0x14   : > { %p124_p1 = scmp.ne.s32.totalorder %s1219_s9, %s1215_s30  ;;  %s1641_s19 = smov (%p34_p0, %s33_s19), 0 }
  0x15   : > { %1609 = sst [smem:[#allocation13_spill]] %s1641_s19  ;;  %s1643_s20 = smov (!%p34_p0, %s36_s20), %s1239_s14 }
  0x16   : > { %s113_s23 = ssub.s32 %s1235_s13, %s1641_s19  ;;  %p125_p2 = scmp.eq.s32.totalorder %s1247_s16, 0 }
  0x17   : > { %p38_p3 = scmp.ge.s32.totalorder %s1643_s20, 4  ;;  %s251_s24 = sadd.s32 1, %s1211_s29 }
  0x18   : > { %p1373_p4 = por %p125_p2, %p124_p1  ;;  %p261_p5 = scmp.ne.s32.totalorder %s1211_s29, %s1207_s28 }
  0x19   : > { %s1645_s20 = smov (%p38_p3, %s1643_s20), 0  ;;  %s1647_s21 = smov (!%p38_p3, %s40_s21), %s1243_s15 }
  0x1a   : > { %1611 = sst [smem:[#allocation14_spill]] %s1645_s20  ;;  %s112_s26 = ssub.s32 %s1239_s14, %s1645_s20 }
  0x1b   : > { %p262_p6 = scmp.eq.s32.totalorder %s925_s17, 15  ;;  %p42_p7 = scmp.ge.s32.totalorder %s1647_s21, 2 }
  0x1c   : > { %s114_s19 = sor.u32 %s113_s23, %s112_s26  ;;  %p267_p10 = scmp.ne.s32.totalorder %s1207_s28, %s1203_s27 }
  0x1d   : > { %p115_p8 = scmp.eq.s32.totalorder %s114_s19, 0  ;;  %p1384_p9 = por %p262_p6, %p261_p5 }
  0x1e   : > { %s1649_s21 = smov (%p42_p7, %s1647_s21), 0  ;;  %p268_p12 = scmp.eq.s32.totalorder %s926_s18, 15 }
  0x1f   : > { %1613 = sst [smem:[#allocation15_spill]] %s1649_s21  ;;  %s248_s1 = ssub.s32 %s1243_s15, %s1649_s21 }
  0x20   : > { %s1391_s2 = scalar_select %p115_p8, %s1219_s9, %s117_s22  }
  0x21   : > { %p249_p11 = scmp.eq.s32.totalorder %s248_s1, 0  ;;  %p1400_p13 = por %p268_p12, %p267_p10 }
  0x22   : > { %1614 = sst [smem:[#allocation16_spill]] %s1391_s2  ;;  %p928_p0 = scmp.ge.s32.totalorder %s1247_s16, 16 }
  0x23   : > { %s1398_s5 = scalar_select %p249_p11, %s1211_s29, %s251_s24  }
  0x24   : > { %s1616_s17 = scalar_select %p1400_p13, 1, 0 }
  0x25   : > { %1615 = sst [smem:[#allocation17_spill]] %s1398_s5  ;;  %290 = sbr.rel (%p928_p0) target bundleno = 56 (0x38), region = 24 }
  0x26   : > { %1617 = sst [smem:[#allocation18_spill]] %s1616_s17 }
  0x2a   : > { %302 = sbr.rel (!%p1373_p4) target bundleno = 56 (0x38), region = 32  ;;  %s304_s19 = sand.u32 (%p1373_p4), 1, %s1219_s9  }
  0x2b   : > { %s930_s22 = sshll.u32 (%p1373_p4), %s1239_s14, 3  ;;  %s929_s23 = sshll.u32 (%p1373_p4), %s304_s19, 4 }
  0x2c   : > { %s308_s1 = sadd.s32 (%p1373_p4), %s1235_s13, %s930_s22  ;;  %s1618_s3 = sld [smem:[#allocation22_spill]] (%p1373_p4) }
  0x2d   : > { %s931_s18 = sshll.u32 (%p1373_p4), %s308_s1, 2  ;;  %s306_s20 = scalar_lea.vmem (%p1373_p4), [#allocation4], %s929_s23 }
  0x32   : > { %s310_s21 = scalar_lea.vmem %s1618_s3, %s931_s18 }
  0x33   : > { %v327_v0 = vld [vmem:[%s310_s21] sm:$0xf]  ;;  %v329_v1 = vld [vmem:[%s310_s21 + $0x8] sm:$0xf]  ;;  %v331_v2 = vld [vmem:[%s310_s21 + $0x10] sm:$0xf] }
  0x34   : > { %328 = vst [vmem:[%s306_s20] sm:$0xf] %v327_v0  ;;  %v333_v3 = vld [vmem:[%s310_s21 + $0x18] sm:$0xf] }
  0x35   : > { %330 = vst [vmem:[%s306_s20 + $0x4] sm:$0xf] %v329_v1 }
  0x36   : > { %332 = vst [vmem:[%s306_s20 + $0x8] sm:$0xf] %v331_v2 }
  0x37   : > { %334 = vst [vmem:[%s306_s20 + $0xc] sm:$0xf] %v333_v3 }
  0x38 PF: > { %p932_p1 = scmp.ge.s32.totalorder %s1247_s16, 1  ;;  %p403_p2 = scmp.lt.s32.totalorder %s1247_s16, 17 }
  0x3a   : > { %p404_p3 = pnand %p932_p1, %p403_p2 }
  0x3b   : > { %s410_s21 = sand.u32 (!%p404_p3), 1, %s1215_s30   ;;  %s1591_s25 = sand.u32 (!%p404_p3), 1, %s1207_s28  }
  0x3c   : > { %407 = sbr.rel (%p404_p3) target bundleno = 681 (0x2a9), region = 89  ;;  %s1417_s20 = sshll.u32 (!%p404_p3), %s410_s21, 4 }
  0x3d   : > { %s934_s19 = sshll.u32 (!%p404_p3), %s1591_s25, 4  ;;  %s935_s22 = sshll.u32 (!%p404_p3), %s1231_s12, 1 }
  0x3e   : > { %p478_p4 = scmp.lt.s32.totalorder (!%p404_p3), %s1227_s11, 3  ;;  %p473_p5 = scmp.lt.s32.totalorder (!%p404_p3), %s935_s22, 3 }
  0x3f   : > { %p480_p6 = scmp.lt.s32.totalorder (!%p404_p3), %s1223_s10, 1  ;;  %s1619_s0 = sld [smem:[#allocation19_spill]] (!%p404_p3) }
  0x40   : > { %s938_s13 = sshll.u32 (!%p404_p3), %s1223_s10, 4  ;;  %p506_p8 = scmp.eq.s32.totalorder (!%p404_p3), %s1227_s11, 0 }
  0x41   : > { %s1425_s23 = scalar_select %p478_p4, %s1227_s11, 3 }
  0x42   : > { %s1651_s22 = smov (!%p473_p5, %s935_s22), 3  ;;  %p488_p7 = scmp.lt.s32.totalorder %s938_s13, 31 }
  0x43   : > { %s481_s1 = scalar_select %p480_p6, %s1223_s10, 1 }
  0x44   : > { %s936_s30 = sshll.u32 %s1651_s22, 3  ;;  %s937_s18 = sshll.u32 %s1425_s23, 1 }
  0x45   : > { %s1432_s21 = scalar_lea.vmem %s1619_s0, %s936_s30  ;;  %s1434_s25 = sadd.s32 %s937_s18, %s481_s1 }
  0x46   : > { %s939_s2 = sshll.u32 %s1425_s23, 5  ;;  %s497_s22 = scalar_lea.vmem %s1584_s6, %s1425_s23 }
  0x47   : > { %s1449_s24 = scalar_lea.vmem %s1585_s7, %s936_s30  ;;  %s1653_s13 = smov (!%p488_p7, %s938_s13), 31 }
  0x48   : > { %p507_p10 = scmp.eq.s32.totalorder %s1223_s10, 0  ;;  %s491_s1 = sadd.s32 %s939_s2, %s1653_s13 }
  0x49   : > { %s940_s18 = sshll.u32 %s491_s1, 2  ;;  %s1620_s26 = sld [smem:[#allocation23_spill]] }
  0x4a   : > { %p508_p11 = pnand %p507_p10, %p506_p8  ;;  %s412_s0 = scalar_lea.vmem [#allocation4], %s1417_s20 }
  0x4b   : > { %s1461_s5 = scalar_lea.vmem [#allocation5], %s934_s19  ;;  %s1621_s9 = sld [smem:[#allocation20_spill]] (!%p508_p11) }
  0x4c   : > { %511 = sbr.rel (%p508_p11) target bundleno = 361 (0x169), region = 97  ;;  %s1622_s19 = sld [smem:[#allocation21_spill]] (!%p508_p11) }
  0x4f   : > { %s1458_s14 = scalar_lea.vmem %s1620_s26, %s940_s18 }
  0x51   : > { %v512_v4 = vld [vmem:[%s1432_s21] sm:$0xff]  ;;  %vm514_vm0 = vcmask 261120   ;;  %v1249_v6 = vmov 0.0   ;;  %v513_v7 = vld [vmem:[%s1432_s21 + $0x8] sm:$0xff]  ;;  %v1250_v9 = vmov 32.0   ;;  %vm580_vm6 = vcmask 257024  }
  0x52   : > { %v515_v5 = vsel %vm514_vm0, %v512_v4, 0.0  ;;  %583 = vst.msk [vmem:[#allocation3] sm:$0xff] %vm514_vm0, %v1249_v6  ;;  %v518_v8 = vsel %vm514_vm0, %v513_v7, 0.0  ;;  %1114 = vrcp.f32 %v1250_v9  ;;  %v1112_v40 = vld [vmem:[%s1621_s9] ss:$0 sm:$0xff] }
  0x53   : > { %584 = vst.msk [vmem:[#allocation3 + $0x8] sm:$0xff] %vm514_vm0, %v1249_v6  ;;  %516 = vadd.xlane.f32.xlu0 %v515_v5  ;;  %v1113_v43 = vld [vmem:[%s1622_s19] ss:$0 sm:$0xff] }
  0x58   : > { %v1115_v10 = vpop.eup %1114 }
  0x59   : > { %v522_v11 = vmul.f32 32.0, %v1115_v10  ;;  %vm526_vm1 = vweird.f32 %v1115_v10 }
  0x5b   : > { %519 = vadd.xlane.f32.xlu0 %v518_v8  ;;  %v523_v12 = vsub.f32 1.0, %v522_v11 }
  0x5d   : > { %v524_v13 = vmul.f32 %v1115_v10, %v523_v12 }
  0x5f   : > { %v525_v14 = vadd.f32 %v1115_v10, %v524_v13 }
  0x61   : > { %v527_v15 = vsel %vm526_vm1, %v1115_v10, %v525_v14 }
  0xc6   : > { %v517_v16 = vpop.xlane.xlu0 %516 }
  0xc7   : > { %v528_v17 = vmul.f32 %v527_v15, %v517_v16 }
  0xc9   : > { %v530_v18 = vsub.f32 %v512_v4, %v528_v17 }
  0xcb   : > { %v532_v19 = vmul.f32 %v530_v18, %v530_v18 }
  0xcd   : > { %v534_v20 = vsel %vm514_vm0, %v532_v19, 0.0 }
  0xce   : > { %535 = vadd.xlane.f32.xlu1 %v534_v20  ;;  %v520_v21 = vpop.xlane.xlu0 %519 }
  0xcf   : > { %v529_v22 = vmul.f32 %v527_v15, %v520_v21 }
  0xd1   : > { %v531_v23 = vsub.f32 %v513_v7, %v529_v22 }
  0xd3   : > { %v533_v24 = vmul.f32 %v531_v23, %v531_v23 }
  0xd5   : > { %v537_v25 = vsel %vm514_vm0, %v533_v24, 0.0 }
  0xd6   : > { %538 = vadd.xlane.f32.xlu1 %v537_v25 }
 0x141   : > { %v536_v26 = vpop.xlane.xlu1 %535 }
 0x142   : > { %v540_v27 = vmul.f32 %v536_v26, %v527_v15 }
 0x144   : > { %v542_v28 = vadd.f32 1e-05, %v540_v27 }
 0x146   : > { %1116 = vrsqrt.f32 %v542_v28  ;;  %vm550_vm3 = vweird.f32 %v542_v28 }
 0x149   : > { %v539_v29 = vpop.xlane.xlu1 %538 }
 0x14a   : > { %v541_v30 = vmul.f32 %v539_v29, %v527_v15 }
 0x14c   : > { %v1117_v31 = vpop.eup %1116  ;;  %v543_v32 = vadd.f32 1e-05, %v541_v30 }
 0x14d   : > { %v545_v33 = vmul.f32 %v1117_v31, %v542_v28  ;;  %vm551_vm2 = vweird.f32 %v1117_v31 }
 0x14e   : > { %1118 = vrsqrt.f32 %v543_v32  ;;  %vm552_vm4 = vmor %vm550_vm3, %vm551_vm2  ;;  %vm560_vm7 = vweird.f32 %v543_v32 }
 0x14f   : > { %v546_v34 = vmul.f32 %v1117_v31, %v545_v33 }
 0x151   : > { %v547_v35 = vmul.f32 0.5, %v546_v34 }
 0x153   : > { %v548_v36 = vsub.f32 1.5, %v547_v35 }
 0x154   : > { %v1119_v37 = vpop.eup %1118 }
 0x155   : > { %v549_v38 = vmul.f32 %v1117_v31, %v548_v36  ;;  %v555_v39 = vmul.f32 %v1119_v37, %v543_v32  ;;  %vm561_vm5 = vweird.f32 %v1119_v37 }
 0x156   : > { %vm562_vm8 = vmor %vm560_vm7, %vm561_vm5 }
 0x157   : > { %v553_v41 = vsel %vm552_vm4, %v1117_v31, %v549_v38  ;;  %v556_v42 = vmul.f32 %v1119_v37, %v555_v39 }
 0x158   : > { %v564_v44 = vmul.f32 %v553_v41, %v530_v18 }
 0x159   : > { %v557_v45 = vmul.f32 0.5, %v556_v42 }
 0x15a   : > { %v570_v46 = vmul.f32 %v1112_v40, %v564_v44 }
 0x15b   : > { %v558_v47 = vsub.f32 1.5, %v557_v45 }
 0x15c   : > { %v576_v48 = vadd.f32 %v1113_v43, %v570_v46 }
 0x15d   : > { %v559_v49 = vmul.f32 %v1119_v37, %v558_v47 }
 0x15e   : > { %v578_v50 = vpack.c.bf16 %v576_v48, %v576_v48 }
 0x15f   : > { %v563_v51 = vsel %vm562_vm8, %v1119_v37, %v559_v49 }
 0x160   : > { %581 = vst.msk [vmem:[#allocation2] sm:$0xf] %vm580_vm6, %v578_v50  ;;  %v565_v52 = vmul.f32 %v563_v51, %v531_v23 }
 0x162   : > { %v571_v53 = vmul.f32 %v1112_v40, %v565_v52 }
 0x164   : > { %v577_v54 = vadd.f32 %v1113_v43, %v571_v53 }
 0x166   : > { %v579_v55 = vpack.c.bf16 %v577_v54, %v577_v54 }
 0x168   : > { %582 = vst.msk [vmem:[#allocation2 + $0x4] sm:$0xf] %vm580_vm6, %v579_v55 }
 0x169 PF: > { %v995_v56 = vld [vmem:[%s412_s0 + $0x8] sm:$0xff]  ;;  %v1003_v57 = vld [vmem:[%s1458_s14 + $0x38] sm:$0xff]  ;;  %vm612_vm9 = vcmask 261120   ;;  %v1001_v61 = vld [vmem:[%s1458_s14 + $0x28] sm:$0xff]  ;;  %v721_v3 = vlaneseq  ;;  %v723_v4 = vstv %s1227_s11  ;;  %vm727_vm10 = vcmask 31744   ;;  %s1623_s20 = scalar_lea.vmem %s1582_s4, %s1434_s25  ;;  %p742_p12 = scmp.eq.s32.totalorder %s1227_s11, 3 }
 0x16a   : > { %622 = vmatpush.bf16.msra.mxu0 %v995_v56  ;;  %v994_v58 = vld [vmem:[%s412_s0] sm:$0xff]  ;;  %705 = vmatpush.bf16.msra.mxu1 %v1003_v57  ;;  %v1002_v59 = vld [vmem:[%s1458_s14 + $0x30] sm:$0xff]  ;;  %v1000_v62 = vld [vmem:[%s1458_s14 + $0x20] sm:$0xff]  ;;  %p743_p0 = scmp.eq.s32.totalorder %s1223_s10, 1 }
 0x16b   : > { %v999_v63 = vld [vmem:[%s1458_s14 + $0x18] sm:$0xff]  ;;  %v998_v0 = vld [vmem:[%s1458_s14 + $0x10] sm:$0xff]  ;;  %v997_v1 = vld [vmem:[%s1458_s14 + $0x8] sm:$0xff]  ;;  %v722_v6 = vand.u32 127, %v721_v3 }
 0x16c   : > { %v996_v2 = vld [vmem:[%s1458_s14] sm:$0xff]  ;;  %v720_v9 = vld [vmem:[%s1449_s24 + $0x8] sm:$0xff]  ;;  %p1500_p1 = pnand %p743_p0, %p742_p12  ;;  %v735_v33 = vld [vmem:[#allocation3 + $0x8] sm:$0xff] }
 0x16d   : > { %v719_v5 = vld [vmem:[%s1449_s24] sm:$0xff]  ;;  %vm724_vm11 = vcmp.eq.s32.totalorder %v722_v6, %v723_v4  ;;  %s649_s24 = scalar_select %p507_p10, 1, 0  ;;  %v734_v27 = vld [vmem:[#allocation3] sm:$0xff] }
 0x16e   : > { %623 = vmatpush.bf16.msra.mxu0 %v994_v58  ;;  %706 = vmatpush.bf16.msra.mxu1 %v1002_v59  ;;  %v725_v7 = vsel %vm724_vm11, %v719_v5, 0.0  ;;  %v726_v10 = vsel %vm724_vm11, %v720_v9, 0.0  ;;  %v1120_v13 = vld [vmem:[%s1623_s20] ss:$0 sm:$0xff] }
 0x16f   : > { %v993_v60 = vld [vmem:[#allocation2] sm:$0xff]  ;;  %v728_v8 = vsel %vm727_vm10, %v725_v7, 0.0  ;;  %v731_v11 = vsel %vm727_vm10, %v726_v10, 0.0  ;;  %s650_s1 = scvt.s32.f32 %s649_s24 }
 0x170   : > { %729 = vadd.xlane.f32.xlu0 %v728_v8  ;;  %v651_v20 = vld [vmem:[%s497_s22] sm:$0x1] }
 0x171   : > { %955 = vmatmul.msk.bf16.vlgmr.msra.gmra.mxu0 %vm612_vm9, %v993_v60  ;;  %v652_v21 = vstv %s650_s1 }
 0x172   : > { %707 = vmatpush.bf16.msra.mxu1 %v1001_v61  ;;  %v653_v22 = vmul.f32 %v652_v21, %v651_v20 }
 0x174   : > { %v655_v23 = vperm.slane %v653_v22, 0 }
 0x176   : > { %708 = vmatpush.bf16.msra.mxu1 %v1000_v62 }
 0x178   : > { %732 = vadd.xlane.f32.xlu0 %v731_v11 }
 0x17a   : > { %709 = vmatpush.bf16.msra.mxu1 %v999_v63 }
 0x17e   : > { %710 = vmatpush.bf16.msra.mxu1 %v998_v0 }
 0x182   : > { %711 = vmatpush.bf16.msra.mxu1 %v997_v1 }
 0x186   : > { %712 = vmatpush.bf16.msra.mxu1 %v996_v2 }
 0x1e3   : > { %v730_v24 = vpop.xlane.xlu0 %729 }
 0x1eb   : > { %v733_v31 = vpop.xlane.xlu0 %732 }
 0x1ee   : > { %v625_v12 = vpop.f32.mrf.mxu0 }
 0x1ef   : > { %v626_v14 = vadd.f32 %v1120_v13, %v625_v12 }
 0x1f1   : > { %v630_v17 = vmax.f32 %v626_v14, 0.0 }
 0x1f6   : > { %v627_v15 = vpop.f32.mrf.mxu0 }
 0x1f7   : > { %v628_v16 = vadd.f32 %v1120_v13, %v627_v15 }
 0x1f9   : > { %v631_v18 = vmax.f32 %v628_v16, 0.0 }
 0x1fb   : > { %v632_v19 = vpack.c.bf16 %v631_v18, %v630_v17 }
 0x1fd   : > { %713 = vmatmul.bf16.vlgmr.msra.gmra.mxu1 %v632_v19 }
 0x27a   : > { %v714_v25 = vpop.f32.mrf.mxu1 }
 0x27b   : > { %v715_v26 = vadd.f32 %v714_v25, %v655_v23 }
 0x27d   : > { %v736_v28 = vmul.f32 %v730_v24, %v715_v26 }
 0x27f   : > { %v738_v29 = vadd.f32 %v736_v28, %v734_v27 }
 0x281   : > { %740 = vst.msk [vmem:[#allocation3] sm:$0xff] %vm612_vm9, %v738_v29 }
 0x282   : > { %v716_v30 = vpop.f32.mrf.mxu1 }
 0x283   : > { %v717_v32 = vadd.f32 %v716_v30, %v655_v23 }
 0x285   : > { %v737_v34 = vmul.f32 %v733_v31, %v717_v32  ;;  %747 = sbr.rel (%p1500_p1) target bundleno = 660 (0x294), region = 101 }
 0x287   : > { %v739_v35 = vadd.f32 %v737_v34, %v735_v33 }
 0x289   : > { %741 = vst.msk [vmem:[#allocation3 + $0x8] sm:$0xff] %vm612_vm9, %v739_v35 }
 0x28a   : > { %v748_v36 = vld [vmem:[#allocation3] sm:$0xff]  ;;  %v750_v37 = vld [vmem:[%s1432_s21] sm:$0xff] }
 0x28b   : > { %v752_v39 = vadd.f32 %v750_v37, %v748_v36  ;;  %v751_v40 = vld [vmem:[%s1432_s21 + $0x8] sm:$0xff] }
 0x28d   : > { %754 = vst.msk [vmem:[%s1461_s5] sm:$0xff] %vm612_vm9, %v752_v39 }
 0x290   : > { %v749_v38 = vld [vmem:[#allocation3 + $0x8] sm:$0xff] }
 0x291   : > { %v753_v41 = vadd.f32 %v751_v40, %v749_v38 }
 0x293   : > { %755 = vst.msk [vmem:[%s1461_s5 + $0x8] sm:$0xff] %vm612_vm9, %v753_v41 }
 0x294 PF: > { %s1004_s10 = sshll.u32 %s1231_s12, 4  ;;  %s1625_s23 = sld [smem:[#allocation24_spill]] }
 0x295   : > { %s769_s15 = sshll.u32 %s1461_s5, 4  ;;  %s1626_s21 = sand.u32 1, %s1207_s28   ;;  %s770_s15 = int_to_ptr.vmem [resolvable:$true] %s769_s15 }
 0x296   : > { %s757_s2 = scalar_lea.sflag [#allocation6], %s1626_s21 }
 0x29a   : > { %s768_s22 = scalar_lea.hbm %s1625_s23, %s1004_s10  ;;  %s1141_s12 = scalar_lea.hbm %s1625_s23, 32 }
 0x29b   : > { %s771_s26 = sshll.u32 %s768_s22, 4  ;;  %s772_s26 = int_to_ptr.hbm [resolvable:$true] %s771_s26 }
 0x29c   : > { %s1135_s29 = sshra.s32 %s772_s26, 4  ;;  %s1136_s29 = int_to_ptr.hbm [resolvable:$true] %s1135_s29 }
 0x29d   : > { %s1137_s9 = scalar_lea.hbm %s1136_s29, 16  ;;  %p1142_p5 = scmp.lt.s32.totalorder %s1136_s29, %s1625_s23 }
 0x29e   : > { %p1138_p2 = scmp.ne.s32.totalorder %s1136_s29, %s1137_s9  ;;  %p1143_p6 = scmp.lt.s32.totalorder %s1141_s12, %s1137_s9 }
 0x2a0   : > { %p1139_p3 = pnand %p1138_p2, %p1384_p9  ;;  %p1144_p7 = por %p1143_p6, %p1142_p5 }
 0x2a2   : > { %p1140_p4 = pneg %p1139_p3 }
 0x2a4   : > { %p1145_p8 = pnand %p1144_p7, %p1140_p4 }
 0x2a6   : > { %1148 = shalt.err (!%p1145_p8)
}
 0x2a7   : > { %s1251_s5 = smov 128   ;;  %s1252_s14 = smov 8  }
 0x2a8   : > { %1005 = dma.vmem_to_hbm [thread:$0]  (%p1384_p9), %s770_s15, 256, %s772_s26, %s757_s2, %s1251_s5, %s1251_s5, %s1252_s14  }
 0x2a9 PF: > { %p1011_p10 = scmp.ge.s32.totalorder %s1247_s16, 2  ;;  %s786_s30 = sand.u32 1, %s1203_s27  }
 0x2aa   : > { %s787_s24 = scalar_lea.sflag [#allocation6], %s786_s30 }
 0x2ab   : > { %p1008_p11 = pnand %p1011_p10, %p1400_p13 }
 0x2ad   : > { %p1009_p12 = pneg %p1008_p11 }
 0x2af   : > { %1198 = dma.done.wait (%p1009_p12), %s787_s24, 256  }
 0x2b0   : > { %1200 = vsyncadd (%p1009_p12), %s787_s24, 4294967040  ;;  %s21_s16 = sadd.s32 1, %s1247_s16   ;;  %s1628_s1 = sld [smem:[#allocation8_spill]] }
 0x2b1   : > { %p18_p0 = scmp.ge.s32.totalorder %s21_s16, 18   ;;  %s1629_s29 = sld [smem:[#allocation17_spill]] }
 0x2b2   : > { %s1630_s30 = sld [smem:[#allocation9_spill]]  ;;  %s1638_s27 = smov %s1207_s28 }
 0x2b3   : > { %s1631_s9 = sld [smem:[#allocation16_spill]] }
 0x2b4   : > { %s1632_s10 = sld [smem:[#allocation10_spill]] }
 0x2b5   : > { %s1633_s11 = sld [smem:[#allocation11_spill]]  ;;  %20 = sbr.rel (!%p18_p0) target bundleno = 14 (0xe), region = 156 }
 0x2b6   : > { %s1634_s12 = sld [smem:[#allocation12_spill]]  ;;  %s1639_s28 = smov %s1628_s1 }
 0x2b7   : > { %s1635_s13 = sld [smem:[#allocation13_spill]] }
 0x2b8   : > { %s1636_s14 = sld [smem:[#allocation14_spill]] }
 0x2b9   : > { %s1637_s15 = sld [smem:[#allocation15_spill]] }
 0x2ba   :  { %793 = vsyncpa [#allocation6], 1 }
 0x2bb   :  { %795 = vsyncpa [#allocation6 + $0x1], 1 }

</bundles_post_ra>
